<compile_context>
chip_gen: v7x
topology: tpu7x:2x2x1
jax: 0.10.0
libtpu: 0.0.40
codegen_flags: <defaults>
</compile_context>

<pallas_src>
import math
from functools import partial

import jax
import jax.numpy as jnp
import numpy as np
from jax import lax
from jax.experimental import pallas as pl
from jax.experimental.pallas import tpu as pltpu


def _round_up(x, m):
    return (x + m - 1) // m * m


_VMEM_CAP = None


def _vmem_capacity_bytes():
    """Physical per-core VMEM, queried once; safe fallback = 64 MiB (v7x)."""
    global _VMEM_CAP
    if _VMEM_CAP is None:
        cap = 64 << 20
        try:
            info_fn = getattr(pltpu, "get_tpu_info", None)
            if info_fn is not None:
                cap = int(info_fn().vmem_capacity_bytes)
        except Exception:
            cap = 64 << 20
        _VMEM_CAP = max(cap, 16 << 20)
    return _VMEM_CAP


def patch_embed_kernel(p_ref, w_ref, b_ref, o_ref):
    # p_ref: (tm, K) patches, w_ref: (K, tn), b_ref: (1, tn) f32, o_ref: (tm, tn).
    acc = jnp.dot(p_ref[...], w_ref[...], preferred_element_type=jnp.float32)
    o_ref[...] = (acc + b_ref[...]).astype(o_ref.dtype)


def _choose_tiles(M, K, E, in_sz, out_sz, budget):
    """Pick (tm, tn, vmem_need_bytes) with no padding of M/K/E:
       * tn == E, or a 128-multiple divisor of E,
       * tm is a multiple of the sublane pack (or == M for tiny M); the last
         M tile may be ragged (Pallas masks the edge block)."""
    sub = 16 if in_sz <= 2 else 8

    def need(tm_, tn_):
        return (2 * tm_ * K * in_sz        # patches tile (double-buffered)
                + 2 * K * tn_ * in_sz      # weight tile (resident along M)
                + 2 * tn_ * 4              # bias (f32)
                + 2 * tm_ * tn_ * out_sz   # output tile (double-buffered)
                + tm_ * tn_ * 4)           # f32 accumulator in the body

    # tn: whole E if it fits, otherwise the largest 128-multiple divisor.
    tn_candidates = [E]
    if E % 128 == 0:
        t = E // 2
        while t >= 128:
            if E % t == 0:
                tn_candidates.append(t)
            t //= 2
    tn = tn_candidates[-1]
    for cand in tn_candidates:
        if need(sub, cand) <= budget:
            tn = cand
            break

    if M <= sub:
        tm = M                              # single full-M tile (always legal)
        if E % 256 == 0 and tn == E:
            tn = E // 2                     # keep >=2 tiles on a parallel axis
        return tm, tn, need(tm, tn)

    # tm: as large as the budget allows (<= 2048 rows), but capped so the M
    # axis keeps >= 2 tiles for pipelining / megacore sharding on v7x.
    tm = sub
    while tm * 2 <= 2048 and need(tm * 2, tn) <= budget:
        tm *= 2
    two_tile_cap = _round_up(-(-M // 2), sub)
    tm = max(sub, min(tm, two_tile_cap))
    return tm, tn, need(tm, tn)


@partial(jax.jit, static_argnums=(3, 4))
def _patch_embed_tokens(x, weight, bias, patch_size, compute_dtype):
    B, C, H, W = x.shape
    p = int(patch_size)
    Hp, Wp = H // p, W // p
    E = weight.shape[0]
    K = C * p * p
    M = B * Hp * Wp

    cdt = np.dtype(compute_dtype)
    in_sz = cdt.itemsize
    out_sz = np.dtype(x.dtype).itemsize

    cap = _vmem_capacity_bytes()
    budget = min(cap // 2, 64 << 20)        # ~32 MiB on v7x, ~64 MiB on v5e/v6e
    tm, tn, need = _choose_tiles(M, K, E, in_sz, out_sz, budget)
    vmem_limit = int(min(max(need * 3 // 2, 32 << 20), cap * 3 // 4))

    # Crop to whole patches (Conv2d stride semantics), then patchify:
    # (B,C,Hp,p,Wp,p) -> (B,Hp,Wp,C,p,p) -> (M,K), cast once to the MXU dtype.
    # One fused XLA pass over x; see TODO at the top for the in-kernel version.
    if H != Hp * p or W != Wp * p:
        x = x[:, :, : Hp * p, : Wp * p]
    patches = (
        x.astype(cdt)
        .reshape(B, C, Hp, p, Wp, p)
        .transpose(0, 2, 4, 1, 3, 5)
        .reshape(M, K)
    )

    # Conv weight (E,C,p,p) -> (K,E) in the MXU dtype; bias stays f32.
    wmat = weight.astype(cdt).reshape(E, K).T
    bvec = bias.astype(jnp.float32).reshape(1, E)

    n_e = E // tn                 # tn always divides E (never padded)
    n_m = -(-M // tm)             # ragged last tile handled by Pallas masking

    out = pl.pallas_call(
        patch_embed_kernel,
        out_shape=jax.ShapeDtypeStruct((M, E), x.dtype),
        grid_spec=pltpu.PrefetchScalarGridSpec(
            num_scalar_prefetch=0,
            grid=(n_e, n_m),      # E outer -> weight/bias stay resident in VMEM
            in_specs=[
                pl.BlockSpec((tm, K), lambda j, i: (i, 0)),   # patches tile
                pl.BlockSpec((K, tn), lambda j, i: (0, j)),   # weight (const in M)
                pl.BlockSpec((1, tn), lambda j, i: (0, j)),   # bias   (const in M)
            ],
            out_specs=pl.BlockSpec((tm, tn), lambda j, i: (i, j)),
        ),
        compiler_params=pltpu.CompilerParams(
            dimension_semantics=("parallel", "parallel"),
            vmem_limit_bytes=vmem_limit,
        ),
        cost_estimate=pl.CostEstimate(
            flops=2 * M * K * E,
            bytes_accessed=M * K * in_sz + K * E * in_sz + E * 4 + M * E * out_sz,
            transcendentals=0,
        ),
    )(patches, wmat, bvec)

    # (M, E) is already contiguous as (B, Hp*Wp, E): free reshape, no un-pad copy.
    return out.reshape(B, Hp * Wp, E)


def patch_embedding(x, weight, bias, patch_size, compute_dtype=jnp.bfloat16):
    """x: (B, C, H, W) NCHW; weight: (E, C, p, p); bias: (E,).

    Returns (tokens, (Hp, Wp)) with tokens of shape (B, Hp*Wp, E) in x.dtype,
    matching PyTorch's  proj(x).flatten(2).transpose(1, 2).  The GEMM runs with
    `compute_dtype` operands (default bf16 = the MXU-native path) and f32
    accumulation; pass compute_dtype=jnp.float32 for bit-faithful f32 math.
    """
    _, _, H, W = x.shape
    Hp, Wp = H // patch_size, W // patch_size
    tokens = _patch_embed_tokens(x, weight, bias, int(patch_size),
                                 np.dtype(compute_dtype))
    return tokens, (Hp, Wp)


if __name__ == "__main__":
    # Small shapes consistent with the module.
    B, C, H, W = 2, 4, 16, 16
    patch_size = 4
    embed_dim = 32

    key = jax.random.PRNGKey(0)
    kx, kw, kb = jax.random.split(key, 3)

    x = jax.random.normal(kx, (B, C, H, W), dtype=jnp.float32)

    # Deterministic Conv2d-style init (kaiming-uniform-ish bounds).
    fan_in = C * patch_size * patch_size
    wb = 1.0 / math.sqrt(fan_in)
    weight = jax.random.uniform(
        kw, (embed_dim, C, patch_size, patch_size),
        minval=-wb, maxval=wb, dtype=jnp.float32)
    bias = jax.random.uniform(
        kb, (embed_dim,), minval=-wb, maxval=wb, dtype=jnp.float32)

    # Reference: strided conv (NCHW, OIHW) then flatten(2).transpose(1, 2).
    Hp, Wp = H // patch_size, W // patch_size
    ref_conv = lax.conv_general_dilated(
        x, weight, window_strides=(patch_size, patch_size), padding="VALID",
        dimension_numbers=("NCHW", "OIHW", "NCHW"),
    ) + bias.reshape(1, embed_dim, 1, 1)
    ref_tokens = ref_conv.reshape(B, embed_dim, Hp * Wp).transpose(0, 2, 1)

    # f32 compute path: exact semantics check.
    tok_f32, (hp, wp) = patch_embedding(x, weight, bias, patch_size,
                                        compute_dtype=jnp.float32)
    tok_f32 = jax.block_until_ready(tok_f32)
    assert tok_f32.shape == (B, Hp * Wp, embed_dim)
    assert (hp, wp) == (Hp, Wp)
    np.testing.assert_allclose(np.asarray(tok_f32), np.asarray(ref_tokens),
                               rtol=1e-5, atol=1e-5)

    # Default bf16-operand path (MXU-native, f32 accumulation): looser check.
    tok_bf16, _ = patch_embedding(x, weight, bias, patch_size)
    tok_bf16 = jax.block_until_ready(tok_bf16)
    assert tok_bf16.shape == (B, Hp * Wp, embed_dim)
    np.testing.assert_allclose(np.asarray(tok_bf16), np.asarray(ref_tokens),
                               rtol=5e-2, atol=5e-2)

    print("KERNEL_OK")
</pallas_src>

<mosaic_0001>
module attributes {stable_mosaic.version = 11 : i64} {
  func.func @patch_embed_kernel(%arg0: i32, %arg1: i32, %arg2: memref<16x64xf32, #tpu.memory_space<vmem>>, %arg3: memref<64x32xf32, #tpu.memory_space<vmem>>, %arg4: memref<1x32xf32, #tpu.memory_space<vmem>>, %arg5: memref<16x32xf32, #tpu.memory_space<vmem>>) attributes {dimension_semantics = [#tpu.dimension_semantics<parallel>, #tpu.dimension_semantics<parallel>], iteration_bounds = array<i64: 1, 2>, scalar_prefetch = 0 : i64, scratch_operands = 0 : i64, tpu.core_type = #tpu.core_type<tc>, window_params = [{transform_indices = @transform_0, window_bounds = array<i64: 16, 64>}, {transform_indices = @transform_1, window_bounds = array<i64: 64, 32>}, {transform_indices = @transform_2, window_bounds = array<i64: 1, 32>}, {transform_indices = @transform_3, window_bounds = array<i64: 16, 32>}]} {
    %c0 = arith.constant 0 : index
    %c0_0 = arith.constant 0 : index
    %0 = vector.load %arg2[%c0, %c0_0] : memref<16x64xf32, #tpu.memory_space<vmem>>, vector<16x64xf32>
    %c0_1 = arith.constant 0 : index
    %c0_2 = arith.constant 0 : index
    %1 = vector.load %arg3[%c0_1, %c0_2] : memref<64x32xf32, #tpu.memory_space<vmem>>, vector<64x32xf32>
    %cst = arith.constant dense<0.000000e+00> : vector<16x32xf32>
    %2 = tpu.matmul %0, %1, %cst {dimension_numbers = #tpu.dot_dimension_numbers<[1], [0], [0], [1], [0, 0, 1, 1], [], []>} : vector<16x64xf32>, vector<64x32xf32>, vector<16x32xf32> -> vector<16x32xf32>
    %c0_3 = arith.constant 0 : index
    %c0_4 = arith.constant 0 : index
    %3 = vector.load %arg4[%c0_3, %c0_4] : memref<1x32xf32, #tpu.memory_space<vmem>>, vector<1x32xf32>
    %4 = vector.broadcast %3 : vector<1x32xf32> to vector<16x32xf32>
    %5 = arith.addf %2, %4 : vector<16x32xf32>
    %c0_5 = arith.constant 0 : index
    %c0_6 = arith.constant 0 : index
    %6 = vector.load %arg5[%c0_5, %c0_6] : memref<16x32xf32, #tpu.memory_space<vmem>>, vector<16x32xf32>
    tpu.vector_store %arg5[%c0_5, %c0_6], %5 {strides = array<i32>} : memref<16x32xf32, #tpu.memory_space<vmem>>, vector<16x32xf32>,
    return
  }
  func.func @transform_0(%arg0: i32, %arg1: i32) -> (i32, i32) {
    %c0_i32 = arith.constant 0 : i32
    %c0_i32_0 = arith.constant 0 : i32
    return %arg1, %c0_i32 : i32, i32
  }
  func.func @transform_1(%arg0: i32, %arg1: i32) -> (i32, i32) {
    %c0_i32 = arith.constant 0 : i32
    %c0_i32_0 = arith.constant 0 : i32
    return %c0_i32, %arg0 : i32, i32
  }
  func.func @transform_2(%arg0: i32, %arg1: i32) -> (i32, i32) {
    %c0_i32 = arith.constant 0 : i32
    %c0_i32_0 = arith.constant 0 : i32
    return %c0_i32, %arg0 : i32, i32
  }
  func.func @transform_3(%arg0: i32, %arg1: i32) -> (i32, i32) {
    %c0_i32 = arith.constant 0 : i32
    return %arg1, %arg0 : i32, i32
  }
}

</mosaic_0001>

<bundles_post_ra>
// kernel: _patch_embed_tokens.1
= control target key start
LH: loop header
LB: loop body
LE: loop exit
PB: predicated region body
PF: predicated region fallthrough
CT: control target
= control target key end

     0   :  { %8 = vsyncpa [#allocation3], 0  ;;  %s798_s0 = inlined_call_operand.vmem [shape: f32[32,64], index: 0, kind: input, shape index: {}]   ;;  %s799_s1 = inlined_call_operand.vmem [shape: f32[64,32], index: 1, kind: input, shape index: {}]   ;;  %s800_s2 = inlined_call_operand.vmem [shape: f32[1,32], index: 2, kind: input, shape index: {}]   ;;  %s801_s3 = inlined_call_operand.hbm [shape: f32[32,32], index: 3, kind: output, shape index: {}]  }
   0x1   :  { %10 = vsyncpa [#allocation3 + $0x1], 0  ;;  %s657_s12 = smov 0   ;;  %s659_s13 = smov 0  }
   0x2   :  { %s661_s14 = smov 0   ;;  %s663_s15 = smov 0  }
   0x3   :  { %s665_s16 = smov 0   ;;  %s667_s17 = smov 0  }
   0x4 LB: > { %s433_s18 = sadd.s32 4294967295, %s632_s17   ;;  %s434_s19 = sadd.s32 4294967294, %s632_s17   ;;  %s632_s17 = sphi %s667_s17, %s16_s17   ;;  %s628_s16 = sphi %s665_s16, %s808_s16   ;;  %s624_s15 = sphi %s663_s15, %s807_s15   ;;  %s620_s14 = sphi %s661_s14, %s806_s14   ;;  %s616_s13 = sphi %s659_s13, %s805_s13   ;;  %s612_s12 = sphi %s657_s12, %s804_s12  }
   0x5   : > { %s25_s20 = sadd.s32 1, %s628_s16  ;;  %s115_s21 = sadd.s32 1, %s620_s14 }
   0x6   : > { %p26_p0 = scmp.ge.s32.totalorder %s25_s20, 2  ;;  %p125_p1 = scmp.ne.s32.totalorder %s620_s14, %s616_s13 }
   0x7   : > { %p126_p2 = scmp.eq.s32.totalorder %s433_s18, 1  ;;  %p131_p3 = scmp.ne.s32.totalorder %s616_s13, %s612_s12 }
   0x8   : > { %s810_s20 = smov (%p26_p0, %s25_s20), 0  ;;  %p132_p5 = scmp.eq.s32.totalorder %s434_s19, 1 }
   0x9   : > { %p697_p4 = por %p126_p2, %p125_p1  ;;  %s110_s23 = ssub.s32 %s628_s16, %s810_s20 }
   0xa   : > { %p439_p6 = scmp.ge.s32.totalorder %s632_s17, 1  ;;  %p113_p7 = scmp.eq.s32.totalorder %s110_s23, 0 }
   0xb   : > { %p704_p8 = por %p132_p5, %p131_p3  ;;  %p172_p9 = scmp.lt.s32.totalorder %s632_s17, 3 }
   0xc   : > { %s710_s25 = scalar_select %p113_p7, %s620_s14, %s115_s21  }
   0xd   : > { %p173_p10 = pnand %p439_p6, %p172_p9 }
   0xe   : > { %v219_v0 = vld [vmem:[%s799_s1] sm:$0xff] (!%p173_p10)  ;;  %v220_v1 = vld [vmem:[%s799_s1 + $0x8] sm:$0xff] (!%p173_p10)  ;;  %v221_v2 = vld [vmem:[%s799_s1 + $0x10] sm:$0xff] (!%p173_p10)  ;;  %s441_s5 = sshll.u32 (!%p173_p10), %s624_s15, 1  ;;  %vm234_vm0 = vcmask (!%p173_p10), 523264   ;;  %s200_s30 = sand.u32 (!%p173_p10), 1, %s616_s13  }
   0xf   : > { %176 = sbr.rel (%p173_p10) target bundleno = 263 (0x107), region = 32  ;;  %v481_v3 = vpack.c.bf16 (!%p173_p10), %v220_v1, %v219_v0  ;;  %v222_v4 = vld [vmem:[%s799_s1 + $0x18] sm:$0xff] (!%p173_p10)  ;;  %p204_p11 = scmp.lt.s32.totalorder (!%p173_p10), %s441_s5, 3  ;;  %v223_v6 = vld [vmem:[%s799_s1 + $0x20] sm:$0xff] (!%p173_p10)  ;;  %v224_v7 = vld [vmem:[%s799_s1 + $0x28] sm:$0xff] (!%p173_p10)  ;;  %vm316_vm1 = vcmask (!%p173_p10), 261120  }
  0x10   : > { %v485_v5 = vpack.c.bf16 (!%p173_p10), %v222_v4, %v221_v2  ;;  %v489_v8 = vpack.c.bf16 (!%p173_p10), %v224_v7, %v223_v6  ;;  %v225_v9 = vld [vmem:[%s799_s1 + $0x30] sm:$0xff] (!%p173_p10)  ;;  %v226_v10 = vld [vmem:[%s799_s1 + $0x38] sm:$0xff] (!%p173_p10)  ;;  %s440_s4 = sshll.u32 (!%p173_p10), %s200_s30, 4  ;;  %v443_v14 = vld [vmem:[%s800_s2] ss:$0 sm:$0xff] (!%p173_p10)  ;;  %s451_s9 = sshll.u32 (!%p173_p10), %s624_s15, 8 }
  0x11   : > { %482 = vmatprep.subr.bf16.mxu0 (!%p173_p10), %v481_v3  ;;  %v493_v12 = vpack.c.bf16 (!%p173_p10), %v226_v10, %v225_v9  ;;  %s202_s7 = scalar_lea.vmem (!%p173_p10), [#allocation2], %s440_s4  ;;  %s752_s19 = scalar_lea.sflag (!%p173_p10), [#allocation3], %s200_s30 }
  0x12   : > { %484 = vmatpush3.bf16.msra.mxu0 (!%p173_p10), %v481_v3  ;;  %s334_s8 = sshll.u32 (!%p173_p10), %s202_s7, 4  ;;  %s634_s21 = smov (!%p173_p10), [#allocation2]   ;;  %s745_s8 = int_to_ptr.vmem [resolvable:$true] %s334_s8 }
  0x13   : > { %486 = vmatprep.subr.bf16.mxu0 (!%p173_p10), %v485_v5  ;;  %s554_s15 = scalar_lea.vmem (!%p173_p10), %s745_s8, 256  ;;  %s558_s23 = sshll.u32 (!%p173_p10), %s634_s21, 4  ;;  %s559_s23 = int_to_ptr.vmem [resolvable:$false] %s558_s23 }
  0x14   : > { %p555_p12 = scmp.ne.s32.totalorder (!%p173_p10), %s745_s8, %s554_s15  ;;  %s560_s26 = scalar_lea.vmem (!%p173_p10), %s559_s23, 512 }
  0x15   : > { %p561_p1 = scmp.lt.s32.totalorder (!%p173_p10), %s745_s8, %s559_s23  ;;  %p562_p2 = scmp.lt.s32.totalorder (!%p173_p10), %s560_s26, %s554_s15 }
  0x16   : > { %s812_s5 = smov (!%p204_p11, %s441_s5), 3  ;;  %488 = vmatpush3.bf16.msra.mxu0 %v485_v5  ;;  %p556_p13 = pnand %p555_p12, %p697_p4 }
  0x17   : > { %s442_s18 = sshll.u32 %s812_s5, 3  ;;  %490 = vmatprep.subr.bf16.mxu0 %v489_v8  ;;  %p563_p3 = por %p562_p2, %p561_p1 }
  0x18   : > { %s207_s29 = scalar_lea.vmem %s798_s0, %s442_s18  ;;  %s750_s18 = scalar_lea.hbm %s801_s3, %s451_s9 }
  0x19   : > { %v217_v11 = vld [vmem:[%s207_s29] sm:$0xff]  ;;  %v218_v13 = vld [vmem:[%s207_s29 + $0x8] sm:$0xff]  ;;  %p557_p0 = pneg %p556_p13 }
  0x1a   : > { %478 = vmatprep.mubr.msk.f32.mxu0 %vm234_vm0, %v217_v11  ;;  %492 = vmatpush3.bf16.msra.mxu0 %v489_v8 }
  0x1b   : > { %494 = vmatprep.subr.bf16.mxu0 %v493_v12  ;;  %p564_p5 = pnand %p563_p3, %p557_p0 }
  0x1e   : > { %496 = vmatpush3.bf16.msra.mxu0 %v493_v12 }
  0x21   : > { %479 = vmatmul.mubr.msk.f32.vlgmr.msra.gmra.mrb[0].mxu0 %vm234_vm0, %v218_v13 }
  0xf4   : > { %v480_v15 = vpop.f32.mrb[0].mxu0 }
  0xf5   : > { %v313_v16 = vadd.f32 %v480_v15, %v443_v14  ;;  %v307_v17 = vpop.f32.mrb[1].mxu0 }
  0xf6   : > { %v308_v18 = vadd.f32 %v443_v14, %v307_v17 }
  0xf7   : > { %318 = vst.msk [vmem:[%s202_s7 + $0x8] sm:$0xff] %vm316_vm1, %v313_v16 }
  0xf8   : > { %317 = vst.msk [vmem:[%s202_s7] sm:$0xff] %vm316_vm1, %v308_v18 }
  0xf9   : > { %567 = shalt.err (!%p564_p5)
}
  0xfa   : > { %s568_s27 = scalar_lea.hbm %s750_s18, 256  ;;  %s572_s30 = scalar_lea.hbm %s801_s3, 512 }
  0xfb   : > { %p569_p6 = scmp.ne.s32.totalorder %s750_s18, %s568_s27  ;;  %p573_p10 = scmp.lt.u32.totalorder %s750_s18, %s801_s3 }
  0xfc   : > { %p574_p11 = scmp.lt.u32.totalorder %s572_s30, %s568_s27  ;;  %p576_p13 = scmp.lt.u32.totalorder %s568_s27, %s750_s18 }
  0xfd   : > { %p570_p7 = pnand %p569_p6, %p697_p4 }
  0xfe   : > { %p575_p12 = por %p574_p11, %p573_p10 }
  0xff   : > { %p571_p9 = pneg %p570_p7 }
 0x100   : > { %p577_p0 = por %p576_p13, %p575_p12 }
 0x102   : > { %p578_p1 = pnand %p577_p0, %p571_p9 }
 0x104   : > { %581 = shalt.err (!%p578_p1)
}
 0x105   : > { %s635_s6 = smov 128   ;;  %s636_s7 = smov 8  }
 0x106   : > { %497 = dma.vmem_to_hbm [thread:$0]  (%p697_p4), %s745_s8, 256, %s750_s18, %s752_s19, %s635_s6, %s635_s6, %s636_s7  }
 0x107 PF: > { %p503_p2 = scmp.ge.s32.totalorder %s632_s17, 2  ;;  %s349_s9 = sand.u32 1, %s612_s12  }
 0x108   : > { %s350_s10 = scalar_lea.sflag [#allocation3], %s349_s9 }
 0x109   : > { %p500_p3 = pnand %p503_p2, %p704_p8 }
 0x10b   : > { %607 = dma.done.wait (!%p500_p3), %s350_s10, 256  }
 0x10c   : > { %609 = vsyncadd (!%p500_p3), %s350_s10, 4294967040  ;;  %s16_s17 = sadd.s32 1, %s632_s17   ;;  %s804_s12 = smov %s616_s13 }
 0x10d   : > { %p13_p5 = scmp.ge.s32.totalorder %s16_s17, 4   ;;  %s805_s13 = smov %s620_s14 }
 0x10e   : > { %s806_s14 = smov %s710_s25  ;;  %s807_s15 = smov %s628_s16 }
 0x10f   : > { %s808_s16 = smov %s810_s20  ;;  %15 = sbr.rel (!%p13_p5) target bundleno = 4 (0x4), region = 73 }
 0x116   :  { %355 = vsyncpa [#allocation3], 1 }
 0x117   :  { %357 = vsyncpa [#allocation3 + $0x1], 1 }

</bundles_post_ra>
